<compile_context>
chip_gen: v5e
topology: v5e:2x2
jax: 0.10.0
libtpu: 0.0.40
codegen_flags: <defaults>
</compile_context>

<pallas_src>
import math

import jax
import jax.numpy as jnp
from jax.experimental import pallas as pl
from jax.experimental.pallas import tpu as pltpu


def _gelu_tanh(x):
    # GELU with tanh approximation (matches torch.nn.GELU(approximate='tanh')).
    c = math.sqrt(2.0 / math.pi)
    return 0.5 * x * (1.0 + jnp.tanh(c * (x + 0.044715 * x * x * x)))


def _round_up(n, m):
    return ((n + m - 1) // m) * m


def _device_vmem_budget():
    """~80% of the device's physical VMEM (compiler temp headroom)."""
    try:
        cap = pltpu.get_tpu_info().vmem_capacity_bytes
    except Exception:
        cap = 64 << 20  # conservative fallback (v7x-sized)
    return int(cap * 0.8)


def _resident_vmem_bytes(tm, cp, hp):
    """VMEM estimate for the resident-weight path (weights budgeted x2)."""
    f32, bf16 = 4, 2
    est = (2 * tm * cp * bf16          # x tile (bf16, double-buffered)
           + 2 * cp * hp * bf16        # w_fc (constant block; budget 2 buffers)
           + 2 * 8 * hp * f32          # b_fc (sublane-padded)
           + 2 * hp * cp * bf16        # w_proj
           + 2 * 8 * cp * f32          # b_proj
           + 2 * tm * cp * f32         # output tile (f32, double-buffered)
           + tm * hp * (f32 + bf16))   # (tm, Hp) h (f32) + gelu (bf16) temps
    return int(est * 1.15) + (2 << 20)


def _htiled_vmem_bytes(tm, th, cp):
    """VMEM estimate for the H-streaming fallback path."""
    f32, bf16 = 4, 2
    est = (2 * tm * cp * bf16
           + 2 * cp * th * bf16
           + 2 * 8 * th * f32
           + 2 * th * cp * bf16
           + 2 * 8 * cp * f32
           + 2 * tm * cp * f32
           + tm * th * (f32 + bf16))
    return int(est * 1.15) + (2 << 20)


# ---------------------------------------------------------------------------
# Kernels
# ---------------------------------------------------------------------------

def mlp_kernel_resident(x_ref, w_fc_ref, b_fc_ref, w_proj_ref, b_proj_ref, o_ref):
    # x_ref:      (tm, Cp) bf16     w_fc_ref: (Cp, Hp) bf16   b_fc_ref: (1, Hp) f32
    # w_proj_ref: (Hp, Cp) bf16     b_proj_ref: (1, Cp) f32   o_ref: (tm, Cp) f32
    h = jnp.dot(x_ref[...], w_fc_ref[...], preferred_element_type=jnp.float32)
    h = h + b_fc_ref[...]
    g = _gelu_tanh(h)  # f32 (safe on v5e; EUP tanh)
    y = jnp.dot(g.astype(jnp.bfloat16), w_proj_ref[...],
                preferred_element_type=jnp.float32)
    o_ref[...] = (y + b_proj_ref[...]).astype(o_ref.dtype)


def mlp_kernel_htiled(x_ref, w_fc_ref, b_fc_ref, w_proj_ref, b_proj_ref, o_ref):
    # Streams the hidden dim in th-chunks (innermost "arbitrary" axis) and
    # accumulates directly into the persistent f32 output block (no scratch).
    h_idx = pl.program_id(1)

    h = jnp.dot(x_ref[...], w_fc_ref[...], preferred_element_type=jnp.float32)
    h = h + b_fc_ref[...]
    g = _gelu_tanh(h)
    contrib = jnp.dot(g.astype(jnp.bfloat16), w_proj_ref[...],
                      preferred_element_type=jnp.float32)

    @pl.when(h_idx == 0)
    def _():
        o_ref[...] = contrib

    @pl.when(h_idx != 0)
    def _():
        o_ref[...] += contrib

    @pl.when(h_idx == pl.num_programs(1) - 1)
    def _():
        o_ref[...] = o_ref[...] + b_proj_ref[...]


# ---------------------------------------------------------------------------
# Wrappers
# ---------------------------------------------------------------------------

def prepare_mlp_params(w_fc, b_fc, w_proj, b_proj):
    """One-time weight prep: pad to lane-dense shapes and cast to bf16.

    Hoisted out of the per-call wrapper so the f32->bf16 cast + pad of the
    weight matrices is paid once, not once per layer call.  Padding is exact:
    padded hidden columns have zero w_fc / b_fc and zero w_proj rows, padded
    embed columns are zero everywhere and sliced out of the result.
    """
    C, H = w_fc.shape
    assert w_proj.shape == (H, C) and b_fc.shape == (H,) and b_proj.shape == (C,)
    Cp = _round_up(C, 128)
    Hp = _round_up(H, 512)   # multiple of 512 so th in {128,256,512} all divide
    wf = jnp.pad(w_fc.astype(jnp.bfloat16), ((0, Cp - C), (0, Hp - H)))
    wp = jnp.pad(w_proj.astype(jnp.bfloat16), ((0, Hp - H), (0, Cp - C)))
    bfc = jnp.pad(b_fc.astype(jnp.float32).reshape(1, H), ((0, 0), (0, Hp - H)))
    bpj = jnp.pad(b_proj.astype(jnp.float32).reshape(1, C), ((0, 0), (0, Cp - C)))
    return dict(wf=wf, bf=bfc, wp=wp, bp=bpj, C=C, H=H, Cp=Cp, Hp=Hp)


def mlp_forward(x, params, *, tm=1024, th=512, force_path=None):
    """Fused MLP forward. x: (B, T, C); params from prepare_mlp_params().

    tm: row tile (default 1024; auto-shrunk for small inputs / VMEM fit).
    th: hidden-dim tile for the streaming fallback path (multiple of 128;
        keep it >=256 in production on v6e/v7x).
    force_path: None (auto) | "resident" | "htiled"  (for testing).
    """
    B, T, C = x.shape
    assert C == params["C"], "x embed dim does not match prepared params"
    Cp, Hp = params["Cp"], params["Hp"]
    wf, bfc, wp, bpj = params["wf"], params["bf"], params["wp"], params["bp"]
    M = B * T

    # Row tile: 16-aligned (bf16 sublane packing), clamped to the row count.
    tm = _round_up(max(16, min(tm, _round_up(M, 16))), 16)
    # Guarantee >=2 row blocks when possible so both v7x TensorCores get work.
    if _round_up(M, tm) // tm < 2 and M > 16:
        tm = max(16, _round_up((M + 1) // 2, 16))

    budget = _device_vmem_budget()

    # Path selection: prefer resident weights (one HBM read of W per call);
    # shrink tm (never below 256) to fit, otherwise stream the hidden dim.
    if force_path is None:
        tm_try = tm
        while _resident_vmem_bytes(tm_try, Cp, Hp) > budget and tm_try > 256:
            tm_try = _round_up(max(256, tm_try // 2), 16)
        use_resident = _resident_vmem_bytes(tm_try, Cp, Hp) <= budget
        if use_resident:
            tm = tm_try
    else:
        use_resident = (force_path == "resident")

    Mp = _round_up(M, tm)
    x2 = jnp.pad(x.reshape(M, C).astype(jnp.bfloat16),
                 ((0, Mp - M), (0, Cp - C)))

    if use_resident:
        grid = (Mp // tm,)
        out = pl.pallas_call(
            mlp_kernel_resident,
            out_shape=jax.ShapeDtypeStruct((Mp, Cp), jnp.float32),
            grid_spec=pltpu.PrefetchScalarGridSpec(
                num_scalar_prefetch=0,
                grid=grid,
                in_specs=[
                    pl.BlockSpec((tm, Cp), lambda i: (i, 0)),   # x rows
                    pl.BlockSpec((Cp, Hp), lambda i: (0, 0)),   # w_fc (resident)
                    pl.BlockSpec((1, Hp), lambda i: (0, 0)),    # b_fc
                    pl.BlockSpec((Hp, Cp), lambda i: (0, 0)),   # w_proj (resident)
                    pl.BlockSpec((1, Cp), lambda i: (0, 0)),    # b_proj
                ],
                out_specs=pl.BlockSpec((tm, Cp), lambda i: (i, 0)),
            ),
            compiler_params=pltpu.CompilerParams(
                dimension_semantics=("parallel",),
                vmem_limit_bytes=budget,
            ),
        )(x2, wf, bfc, wp, bpj)
    else:
        th = min(_round_up(max(128, th), 128), Hp)
        assert Hp % th == 0, "th must divide the padded hidden dim"
        grid = (Mp // tm, Hp // th)
        out = pl.pallas_call(
            mlp_kernel_htiled,
            out_shape=jax.ShapeDtypeStruct((Mp, Cp), jnp.float32),
            grid_spec=pltpu.PrefetchScalarGridSpec(
                num_scalar_prefetch=0,
                grid=grid,
                in_specs=[
                    pl.BlockSpec((tm, Cp), lambda i, h: (i, 0)),   # x rows
                    pl.BlockSpec((Cp, th), lambda i, h: (0, h)),   # w_fc H-chunk
                    pl.BlockSpec((1, th), lambda i, h: (0, h)),    # b_fc H-chunk
                    pl.BlockSpec((th, Cp), lambda i, h: (h, 0)),   # w_proj H-chunk
                    pl.BlockSpec((1, Cp), lambda i, h: (0, 0)),    # b_proj
                ],
                out_specs=pl.BlockSpec((tm, Cp), lambda i, h: (i, 0)),
            ),
            compiler_params=pltpu.CompilerParams(
                dimension_semantics=("parallel", "arbitrary"),
                vmem_limit_bytes=budget,
            ),
        )(x2, wf, bfc, wp, bpj)

    return out[:M, :C].reshape(B, T, C).astype(x.dtype)


# ---------------------------------------------------------------------------
# References
# ---------------------------------------------------------------------------

def _reference_bf16(x, w_fc, b_fc, w_proj, b_proj):
    """Reference with the same bf16-input / f32-accumulate matmul semantics."""
    B, T, C = x.shape
    x2 = x.reshape(B * T, C).astype(jnp.bfloat16)
    h = jnp.dot(x2, w_fc.astype(jnp.bfloat16),
                preferred_element_type=jnp.float32) + b_fc
    g = _gelu_tanh(h)
    y = jnp.dot(g.astype(jnp.bfloat16), w_proj.astype(jnp.bfloat16),
                preferred_element_type=jnp.float32) + b_proj
    return y.reshape(B, T, C)


def _reference_f32(x, w_fc, b_fc, w_proj, b_proj):
    B, T, C = x.shape
    x2 = x.reshape(B * T, C)
    h = jnp.dot(x2, w_fc) + b_fc
    g = _gelu_tanh(h)
    y = jnp.dot(g, w_proj) + b_proj
    return y.reshape(B, T, C)


if __name__ == "__main__":
    # Small shapes consistent with the module: batch=2, seq=11, n_embd=96.
    # Odd T / non-128 C exercise the row/lane padding paths; the forced htiled
    # run with th=128 exercises multi-step hidden-dim accumulation.
    B, T, C = 2, 11, 96
    H = 4 * C

    key = jax.random.PRNGKey(0)
    kx, k1, k2, k3, k4 = jax.random.split(key, 5)

    x = jax.random.normal(kx, (B, T, C), dtype=jnp.float32)

    # nn.Linear-style init (uniform +/- 1/sqrt(fan_in)), stored as (in, out).
    bound_fc = 1.0 / math.sqrt(C)
    w_fc = jax.random.uniform(k1, (C, H), minval=-bound_fc, maxval=bound_fc,
                              dtype=jnp.float32)
    b_fc = jax.random.uniform(k2, (H,), minval=-bound_fc, maxval=bound_fc,
                              dtype=jnp.float32)
    bound_pj = 1.0 / math.sqrt(H)
    w_proj = jax.random.uniform(k3, (H, C), minval=-bound_pj, maxval=bound_pj,
                                dtype=jnp.float32)
    b_proj = jax.random.uniform(k4, (C,), minval=-bound_pj, maxval=bound_pj,
                                dtype=jnp.float32)

    # One-time weight prep (hoisted out of the per-call wrapper).
    params = prepare_mlp_params(w_fc, b_fc, w_proj, b_proj)

    # Auto path (resident weights at this width), plus both forced paths.
    y_auto = jax.block_until_ready(mlp_forward(x, params))
    y_res = jax.block_until_ready(mlp_forward(x, params, force_path="resident"))
    y_ht = jax.block_until_ready(
        mlp_forward(x, params, th=128, force_path="htiled"))

    assert y_auto.shape == (B, T, C)
    assert y_res.shape == (B, T, C)
    assert y_ht.shape == (B, T, C)

    # Tight check against a bf16-matmul / f32-accumulate reference.
    y_bf = _reference_bf16(x, w_fc, b_fc, w_proj, b_proj)
    for name, y in (("auto", y_auto), ("resident", y_res), ("htiled", y_ht)):
        assert jnp.allclose(y, y_bf, atol=2e-2, rtol=2e-2), (
            f"{name} path mismatch vs bf16 reference")

    # Looser check against the pure-f32 module semantics (bf16 MXU rounding).
    y_f32 = _reference_f32(x, w_fc, b_fc, w_proj, b_proj)
    for name, y in (("auto", y_auto), ("resident", y_res), ("htiled", y_ht)):
        assert jnp.allclose(y, y_f32, atol=7e-2, rtol=5e-2), (
            f"{name} path mismatch vs f32 reference")

    print("KERNEL_OK")
</pallas_src>

<mosaic_0001>
module attributes {stable_mosaic.version = 11 : i64} {
  func.func @mlp_kernel_resident(%arg0: i32, %arg1: memref<16x128xbf16, #tpu.memory_space<vmem>>, %arg2: memref<128x512xbf16, #tpu.memory_space<vmem>>, %arg3: memref<1x512xf32, #tpu.memory_space<vmem>>, %arg4: memref<512x128xbf16, #tpu.memory_space<vmem>>, %arg5: memref<1x128xf32, #tpu.memory_space<vmem>>, %arg6: memref<16x128xf32, #tpu.memory_space<vmem>>) attributes {dimension_semantics = [#tpu.dimension_semantics<parallel>], iteration_bounds = array<i64: 2>, scalar_prefetch = 0 : i64, scratch_operands = 0 : i64, tpu.core_type = #tpu.core_type<tc>, window_params = [{transform_indices = @transform_0, window_bounds = array<i64: 16, 128>}, {pipeline_mode = #tpu.pipeline_mode<synchronous>, transform_indices = @transform_1, window_bounds = array<i64: 128, 512>}, {pipeline_mode = #tpu.pipeline_mode<synchronous>, transform_indices = @transform_2, window_bounds = array<i64: 1, 512>}, {pipeline_mode = #tpu.pipeline_mode<synchronous>, transform_indices = @transform_3, window_bounds = array<i64: 512, 128>}, {pipeline_mode = #tpu.pipeline_mode<synchronous>, transform_indices = @transform_4, window_bounds = array<i64: 1, 128>}, {transform_indices = @transform_5, window_bounds = array<i64: 16, 128>}]} {
    %c0 = arith.constant 0 : index
    %c0_0 = arith.constant 0 : index
    %0 = vector.load %arg1[%c0, %c0_0] : memref<16x128xbf16, #tpu.memory_space<vmem>>, vector<16x128xbf16>
    %c0_1 = arith.constant 0 : index
    %c0_2 = arith.constant 0 : index
    %1 = vector.load %arg2[%c0_1, %c0_2] : memref<128x512xbf16, #tpu.memory_space<vmem>>, vector<128x512xbf16>
    %cst = arith.constant dense<0.000000e+00> : vector<16x512xf32>
    %2 = tpu.matmul %0, %1, %cst {dimension_numbers = #tpu.dot_dimension_numbers<[1], [0], [0], [1], [0, 0, 1, 1], [], []>} : vector<16x128xbf16>, vector<128x512xbf16>, vector<16x512xf32> -> vector<16x512xf32>
    %c0_3 = arith.constant 0 : index
    %c0_4 = arith.constant 0 : index
    %3 = vector.load %arg3[%c0_3, %c0_4] : memref<1x512xf32, #tpu.memory_space<vmem>>, vector<1x512xf32>
    %4 = vector.broadcast %3 : vector<1x512xf32> to vector<16x512xf32>
    %5 = arith.addf %2, %4 : vector<16x512xf32>
    %cst_5 = arith.constant 5.000000e-01 : f32
    %6 = vector.broadcast %cst_5 : f32 to vector<16x512xf32>
    %7 = arith.mulf %6, %5 : vector<16x512xf32>
    %cst_6 = arith.constant 4.471500e-02 : f32
    %8 = vector.broadcast %cst_6 : f32 to vector<16x512xf32>
    %9 = arith.mulf %8, %5 : vector<16x512xf32>
    %10 = arith.mulf %9, %5 : vector<16x512xf32>
    %11 = arith.mulf %10, %5 : vector<16x512xf32>
    %12 = arith.addf %5, %11 : vector<16x512xf32>
    %cst_7 = arith.constant 0.797884583 : f32
    %13 = vector.broadcast %cst_7 : f32 to vector<16x512xf32>
    %14 = arith.mulf %13, %12 : vector<16x512xf32>
    %15 = math.tanh %14 : vector<16x512xf32>
    %cst_8 = arith.constant 1.000000e+00 : f32
    %16 = vector.broadcast %cst_8 : f32 to vector<16x512xf32>
    %17 = arith.addf %16, %15 : vector<16x512xf32>
    %18 = arith.mulf %7, %17 : vector<16x512xf32>
    %19 = arith.truncf %18 : vector<16x512xf32> to vector<16x512xbf16>
    %c0_9 = arith.constant 0 : index
    %c0_10 = arith.constant 0 : index
    %20 = vector.load %arg4[%c0_9, %c0_10] : memref<512x128xbf16, #tpu.memory_space<vmem>>, vector<512x128xbf16>
    %cst_11 = arith.constant dense<0.000000e+00> : vector<16x128xf32>
    %21 = tpu.matmul %19, %20, %cst_11 {dimension_numbers = #tpu.dot_dimension_numbers<[1], [0], [0], [1], [0, 0, 1, 1], [], []>} : vector<16x512xbf16>, vector<512x128xbf16>, vector<16x128xf32> -> vector<16x128xf32>
    %c0_12 = arith.constant 0 : index
    %c0_13 = arith.constant 0 : index
    %22 = vector.load %arg5[%c0_12, %c0_13] : memref<1x128xf32, #tpu.memory_space<vmem>>, vector<1x128xf32>
    %23 = vector.broadcast %22 : vector<1x128xf32> to vector<16x128xf32>
    %24 = arith.addf %21, %23 : vector<16x128xf32>
    %c0_14 = arith.constant 0 : index
    %c0_15 = arith.constant 0 : index
    %25 = vector.load %arg6[%c0_14, %c0_15] : memref<16x128xf32, #tpu.memory_space<vmem>>, vector<16x128xf32>
    tpu.vector_store %arg6[%c0_14, %c0_15], %24 {strides = array<i32>} : memref<16x128xf32, #tpu.memory_space<vmem>>, vector<16x128xf32>,
    return
  }
  func.func @transform_0(%arg0: i32) -> (i32, i32) {
    %c0_i32 = arith.constant 0 : i32
    %c0_i32_0 = arith.constant 0 : i32
    return %arg0, %c0_i32 : i32, i32
  }
  func.func @transform_1(%arg0: i32) -> (i32, i32) {
    %c0_i32 = arith.constant 0 : i32
    %c0_i32_0 = arith.constant 0 : i32
    %c0_i32_1 = arith.constant 0 : i32
    return %c0_i32, %c0_i32_0 : i32, i32
  }
  func.func @transform_2(%arg0: i32) -> (i32, i32) {
    %c0_i32 = arith.constant 0 : i32
    %c0_i32_0 = arith.constant 0 : i32
    %c0_i32_1 = arith.constant 0 : i32
    return %c0_i32, %c0_i32_0 : i32, i32
  }
  func.func @transform_3(%arg0: i32) -> (i32, i32) {
    %c0_i32 = arith.constant 0 : i32
    %c0_i32_0 = arith.constant 0 : i32
    %c0_i32_1 = arith.constant 0 : i32
    return %c0_i32, %c0_i32_0 : i32, i32
  }
  func.func @transform_4(%arg0: i32) -> (i32, i32) {
    %c0_i32 = arith.constant 0 : i32
    %c0_i32_0 = arith.constant 0 : i32
    %c0_i32_1 = arith.constant 0 : i32
    return %c0_i32, %c0_i32_0 : i32, i32
  }
  func.func @transform_5(%arg0: i32) -> (i32, i32) {
    %c0_i32 = arith.constant 0 : i32
    %c0_i32_0 = arith.constant 0 : i32
    return %arg0, %c0_i32 : i32, i32
  }
}

</mosaic_0001>

<bundles_post_ra>
// kernel: tpu_custom_call.1
= control target key start
LH: loop header
LB: loop body
LE: loop exit
PB: predicated region body
PF: predicated region fallthrough
CT: control target
= control target key end

     0   :  { %10 = vsyncpa [#allocation3], 0  ;;  %s1960_s0 = inlined_call_operand.hbm [shape: bf16[32,128], index: 0, kind: input, shape index: {}]   ;;  %s1961_s1 = inlined_call_operand.hbm [shape: bf16[128,512], index: 1, kind: input, shape index: {}]   ;;  %s1962_s2 = inlined_call_operand.hbm [shape: f32[1,512], index: 2, kind: input, shape index: {}]   ;;  %s1963_s3 = inlined_call_operand.hbm [shape: bf16[512,128], index: 3, kind: input, shape index: {}]   ;;  %s1964_s4 = inlined_call_operand.vmem [shape: f32[1,128], index: 4, kind: input, shape index: {}]   ;;  %s1965_s5 = inlined_call_operand.hbm [shape: f32[32,128], index: 5, kind: output, shape index: {}]  }
   0x1   :  { %12 = vsyncpa [#allocation3 + $0x1], 0 }
   0x2   :  { %13 = vsyncpa [#allocation6], 0 }
   0x3   :  { %14 = vsyncpa [#allocation9], 0 }
   0x4   :  { %15 = vsyncpa [#allocation4], 0 }
   0x5   :  { %17 = vsyncpa [#allocation4 + $0x1], 0  ;;  %s1755_s18 = smov 0   ;;  %s1757_s19 = smov 0  }
   0x6   :  { %s1759_s20 = smov 0   ;;  %s1761_s21 = smov 0  }
   0x7 LB: > { %s1776_s22 = sadd.s32 4294967295, %s1714_s21   ;;  %s1073_s23 = sadd.s32 4294967294, %s1714_s21   ;;  %s1714_s21 = sphi %s1761_s21, %s1978_s21   ;;  %s1710_s20 = sphi %s1759_s20, %s1977_s20   ;;  %s1706_s19 = sphi %s1757_s19, %s1976_s19   ;;  %s1702_s18 = sphi %s1755_s18, %s1975_s18  }
   0x8   : > { %p43_p0 = scmp.ne.s32.totalorder %s1706_s19, %s1702_s18  ;;  %p44_p1 = scmp.eq.s32.totalorder %s1776_s22, 0 }
   0x9   : > { %p151_p2 = scmp.eq.s32.totalorder %s1776_s22, 1  ;;  %p157_p3 = scmp.eq.s32.totalorder %s1073_s23, 1 }
   0xa   : > { %p1785_p4 = por %p44_p1, %p43_p0  ;;  %p1074_p5 = scmp.ge.s32.totalorder %s1714_s21, 1 }
   0xb   : > { %p1790_p6 = por %p157_p3, %p43_p0  ;;  %p164_p7 = scmp.lt.s32.totalorder %s1714_s21, 3 }
   0xc   : > { %s175_s28 = sshll.u32 %s1961_s1, 4  ;;  %s1716_s30 = smov [#allocation5]   ;;  %s176_s28 = int_to_ptr.hbm [resolvable:$true] %s175_s28 }
   0xd   : > { %p1798_p8 = pnand %p1074_p5, %p164_p7  ;;  %s177_s6 = sshll.u32 %s1716_s30, 4  ;;  %s178_s6 = int_to_ptr.vmem [resolvable:$true] %s177_s6 }
   0xe   : > { %s190_s10 = sshll.u32 %s1962_s2, 4  ;;  %s1717_s11 = smov 256   ;;  %s191_s10 = int_to_ptr.hbm [resolvable:$true] %s190_s10 }
   0xf   : > { %p1436_p9 = pneg %p1798_p8  ;;  %s1718_s12 = smov 16  }
  0x10   : > { %s1719_s13 = smov [#allocation7]   ;;  %s201_s17 = sshll.u32 %s1963_s3, 4  ;;  %s202_s17 = int_to_ptr.hbm [resolvable:$true] %s201_s17 }
  0x11   : > { %p1806_p10 = pnand %p1436_p9, %p44_p1  ;;  %s192_s14 = sshll.u32 %s1719_s13, 4  ;;  %s193_s14 = int_to_ptr.vmem [resolvable:$true] %s192_s14 }
  0x12   : > { %s1720_s23 = smov [#allocation8]   ;;  %s1966_s27 = smov 64  }
  0x13   : > { %1439 = dma.hbm_to_vmem [thread:$0]  (!%p1806_p10), %s176_s28, 4096, %s178_s6, [#allocation6], %s1717_s11, %s1717_s11, %s1718_s12  }
  0x14   : > { %1442 = dma.hbm_to_vmem [thread:$0]  (!%p1806_p10), %s191_s10, 64, %s193_s14, [#allocation6]  }
  0x15   : > { %s203_s26 = sshll.u32 %s1720_s23, 4  ;;  %s1722_s28 = smov 4   ;;  %s204_s26 = int_to_ptr.vmem [resolvable:$true] %s203_s26 }
  0x16   : > { %1445 = dma.hbm_to_vmem [thread:$0]  (!%p1806_p10), %s202_s17, 4096, %s204_s26, [#allocation9], %s1966_s27, %s1966_s27, %s1722_s28  }
  0x17   : > { %s1827_s30 = sadd.s32 1, %s1714_s21   ;;  %s30_s8 = sadd.s32 1, %s1710_s20 }
  0x18   : > { %s27_s6 = ssub.s32 %s1714_s21, %s1827_s30  ;;  %p37_p13 = scmp.ne.s32.totalorder %s1710_s20, %s1706_s19 }
  0x19   : > { %p28_p12 = scmp.eq.s32.totalorder %s27_s6, 0  ;;  %p38_p0 = scmp.eq.s32.totalorder %s1714_s21, 0 }
  0x1a   : > { %p1840_p3 = por %p151_p2, %p37_p13  ;;  %p1457_p5 = scmp.lt.s32.totalorder %s1714_s21, 2 }
  0x1b   : > { %s1836_s9 = scalar_select %p28_p12, %s1710_s20, %s30_s8  }
  0x1c   : > { %s220_s7 = sand.u32 1, %s1710_s20   ;;  %s1353_s11 = sshll.u32 %s1714_s21, 3 }
  0x1d   : > { %p39_p7 = por %p38_p0, %p37_p13  ;;  %s1079_s12 = sshll.u32 %s220_s7, 3 }
  0x1e   : > { %s229_s15 = scalar_lea.hbm %s1960_s0, %s1353_s11  ;;  %s224_s17 = scalar_lea.vmem [#allocation2], %s1079_s12 }
  0x1f   : > { %s230_s16 = sshll.u32 %s229_s15, 4  ;;  %s232_s23 = sshll.u32 %s224_s17, 4  ;;  %s231_s16 = int_to_ptr.hbm [resolvable:$true] %s230_s16  ;;  %s233_s23 = int_to_ptr.vmem [resolvable:$true] %s232_s23 }
  0x20   : > { %p1850_p9 = pnand %p1457_p5, %p39_p7  ;;  %s221_s6 = scalar_lea.sflag [#allocation3], %s220_s7 }
  0x21   : > { %s1610_s8 = sshra.s32 %s231_s16, 4  ;;  %s1617_s12 = scalar_lea.hbm %s1960_s0, 16  ;;  %s1611_s8 = int_to_ptr.hbm [resolvable:$true] %s1610_s8 }
  0x22   : > { %s1612_s27 = scalar_lea.hbm %s1611_s8, 8  ;;  %p1614_p10 = pneg %p1850_p9 }
  0x23   : > { %p1613_p2 = scmp.ne.s32.totalorder %s1611_s8, %s1612_s27  ;;  %p1618_p0 = scmp.lt.s32.totalorder %s1611_s8, %s1960_s0 }
  0x24   : > { %p1619_p5 = scmp.lt.s32.totalorder %s1617_s12, %s1612_s27 }
  0x25   : > { %p1615_p12 = pnand %p1614_p10, %p1613_p2 }
  0x26   : > { %p1620_p7 = por %p1619_p5, %p1618_p0 }
  0x27   : > { %p1616_p13 = pneg %p1615_p12 }
  0x29   : > { %p1621_p11 = pnand %p1620_p7, %p1616_p13 }
  0x2b   : > { %1624 = shalt.err (!%p1621_p11)
}
  0x2c   : > { %s1973_s7 = smov 64   ;;  %244 = sbr.rel (%p1798_p8) target bundleno = 403 (0x193), region = 40 }
  0x2d   : > { %1449 = dma.hbm_to_vmem [thread:$0]  (!%p1850_p9), %s231_s16, 128, %s233_s23, %s221_s6, %s1973_s7, %s1973_s7, %s1722_s28  }
  0x2e   : > { %s1870_s17 = sand.u32 (!%p1798_p8), 1, %s1706_s19  }
  0x2f   : > { %s1083_s8 = sshll.u32 (!%p1798_p8), %s1870_s17, 3  ;;  %s247_s27 = scalar_lea.sflag (!%p1798_p8), [#allocation3], %s1870_s17 }
  0x30   : > { %s1874_s11 = scalar_lea.vmem (!%p1798_p8), [#allocation2], %s1083_s8 }
  0x31   : > { %1685 = dma.done.wait (%p1785_p4), %s247_s27, 128  }
  0x32   : > { %1687 = vsyncadd (%p1785_p4), %s247_s27, 4294967168 }
  0x33   : > { %1689 = dma.done.wait (%p44_p1), [#allocation6], 4160  }
  0x34   : > { %1691 = vsyncadd (%p44_p1), [#allocation6], 4294963136 }
  0x35   : > { %1693 = dma.done.wait (%p44_p1), [#allocation9], 4096  }
  0x36   : > { %1695 = vsyncadd (%p44_p1), [#allocation9], 4294963200  ;;  %v1206_v0 = vld [vmem:[#allocation5 + $0xe0] sm:$0xf]  ;;  %v1385_v1 = vld [vmem:[#allocation5 + $0xec] sm:$0xf0] }
  0x37   : > { %v1383_v2 = vld [vmem:[#allocation5 + $0xe4] sm:$0xf]  ;;  %v1207_v3 = vor.u32 %v1385_v1, %v1206_v0  ;;  %v1208_v4 = vld [vmem:[#allocation5 + $0xf0] sm:$0xf0]  ;;  %v1214_v5 = vld [vmem:[#allocation5 + $0xe8] sm:$0xf] }
  0x38   : > { %v1386_v6 = vld [vmem:[#allocation5 + $0xf4] sm:$0xf0]  ;;  %v1211_v7 = vor.u32 %v1383_v2, %v1208_v4  ;;  %v1384_v9 = vld [vmem:[#allocation5 + $0xec] sm:$0xf]  ;;  %v1216_v10 = vld [vmem:[#allocation5 + $0xf8] sm:$0xf0] }
  0x39   : > { %v1215_v8 = vor.u32 %v1386_v6, %v1214_v5  ;;  %v1190_v11 = vld [vmem:[#allocation5 + $0xc0] sm:$0xf]  ;;  %505 = vmatpush.bf16.msra.mxu0 %v1207_v3  ;;  %v1219_v12 = vor.u32 %v1384_v9, %v1216_v10  ;;  %v1381_v13 = vld [vmem:[#allocation5 + $0xcc] sm:$0xf0]  ;;  %v1379_v14 = vld [vmem:[#allocation5 + $0xc4] sm:$0xf] }
  0x3a   : > { %v1192_v15 = vld [vmem:[#allocation5 + $0xd0] sm:$0xf0]  ;;  %519 = vmatpush.bf16.msra.mxu1 %v1211_v7  ;;  %v1191_v16 = vor.u32 %v1381_v13, %v1190_v11  ;;  %v1198_v18 = vld [vmem:[#allocation5 + $0xc8] sm:$0xf]  ;;  %v1382_v19 = vld [vmem:[#allocation5 + $0xd4] sm:$0xf0] }
  0x3b   : > { %533 = vmatpush.bf16.msra.mxu2 %v1215_v8  ;;  %v1195_v17 = vor.u32 %v1379_v14, %v1192_v15  ;;  %v1380_v20 = vld [vmem:[#allocation5 + $0xcc] sm:$0xf]  ;;  %547 = vmatpush.bf16.msra.mxu3 %v1219_v12  ;;  %v1199_v21 = vor.u32 %v1382_v19, %v1198_v18  ;;  %v1200_v22 = vld [vmem:[#allocation5 + $0xd8] sm:$0xf0]  ;;  %v1174_v23 = vld [vmem:[#allocation5 + $0xa0] sm:$0xf] }
  0x3c   : > { %v1377_v24 = vld [vmem:[#allocation5 + $0xac] sm:$0xf0]  ;;  %v1203_v25 = vor.u32 %v1380_v20, %v1200_v22  ;;  %v1375_v26 = vld [vmem:[#allocation5 + $0xa4] sm:$0xf]  ;;  %v1176_v27 = vld [vmem:[#allocation5 + $0xb0] sm:$0xf0] }
  0x3d   : > { %v1182_v28 = vld [vmem:[#allocation5 + $0xa8] sm:$0xf]  ;;  %506 = vmatpush.bf16.msra.mxu0 %v1191_v16  ;;  %v1175_v29 = vor.u32 %v1377_v24, %v1174_v23  ;;  %v1378_v30 = vld [vmem:[#allocation5 + $0xb4] sm:$0xf0]  ;;  %v1376_v31 = vld [vmem:[#allocation5 + $0xac] sm:$0xf]  ;;  %v1179_v33 = vor.u32 %v1375_v26, %v1176_v27 }
  0x3e   : > { %v1184_v32 = vld [vmem:[#allocation5 + $0xb8] sm:$0xf0]  ;;  %520 = vmatpush.bf16.msra.mxu1 %v1195_v17  ;;  %v1183_v34 = vor.u32 %v1378_v30, %v1182_v28  ;;  %v1158_v35 = vld [vmem:[#allocation5 + $0x80] sm:$0xf]  ;;  %v1373_v36 = vld [vmem:[#allocation5 + $0x8c] sm:$0xf0] }
  0x3f   : > { %534 = vmatpush.bf16.msra.mxu2 %v1199_v21  ;;  %v1371_v37 = vld [vmem:[#allocation5 + $0x84] sm:$0xf]  ;;  %548 = vmatpush.bf16.msra.mxu3 %v1203_v25  ;;  %v1187_v38 = vor.u32 %v1376_v31, %v1184_v32  ;;  %v1160_v39 = vld [vmem:[#allocation5 + $0x90] sm:$0xf0]  ;;  %v1166_v40 = vld [vmem:[#allocation5 + $0x88] sm:$0xf]  ;;  %v1159_v44 = vor.u32 %v1373_v36, %v1158_v35 }
  0x40   : > { %v1374_v41 = vld [vmem:[#allocation5 + $0x94] sm:$0xf0]  ;;  %v1372_v42 = vld [vmem:[#allocation5 + $0x8c] sm:$0xf]  ;;  %v1168_v43 = vld [vmem:[#allocation5 + $0x98] sm:$0xf0]  ;;  %v1163_v45 = vor.u32 %v1371_v37, %v1160_v39 }
  0x41   : > { %507 = vmatpush.bf16.msra.mxu0 %v1175_v29  ;;  %v1167_v46 = vor.u32 %v1374_v41, %v1166_v40  ;;  %v1142_v47 = vld [vmem:[#allocation5 + $0x60] sm:$0xf]  ;;  %v1369_v48 = vld [vmem:[#allocation5 + $0x6c] sm:$0xf0]  ;;  %v1367_v49 = vld [vmem:[#allocation5 + $0x64] sm:$0xf]  ;;  %v1171_v50 = vor.u32 %v1372_v42, %v1168_v43 }
  0x42   : > { %521 = vmatpush.bf16.msra.mxu1 %v1179_v33  ;;  %v1144_v51 = vld [vmem:[#allocation5 + $0x70] sm:$0xf0]  ;;  %v1150_v52 = vld [vmem:[#allocation5 + $0x68] sm:$0xf]  ;;  %v1370_v53 = vld [vmem:[#allocation5 + $0x74] sm:$0xf0]  ;;  %v1143_v56 = vor.u32 %v1369_v48, %v1142_v47 }
  0x43   : > { %535 = vmatpush.bf16.msra.mxu2 %v1183_v34  ;;  %549 = vmatpush.bf16.msra.mxu3 %v1187_v38  ;;  %v1368_v54 = vld [vmem:[#allocation5 + $0x6c] sm:$0xf]  ;;  %v1152_v55 = vld [vmem:[#allocation5 + $0x78] sm:$0xf0]  ;;  %v1147_v57 = vor.u32 %v1367_v49, %v1144_v51  ;;  %v1151_v58 = vor.u32 %v1370_v53, %v1150_v52  ;;  %v1126_v59 = vld [vmem:[#allocation5 + $0x40] sm:$0xf] }
  0x44   : > { %v1365_v60 = vld [vmem:[#allocation5 + $0x4c] sm:$0xf0]  ;;  %v1363_v61 = vld [vmem:[#allocation5 + $0x44] sm:$0xf]  ;;  %v1155_v62 = vor.u32 %v1368_v54, %v1152_v55  ;;  %v1128_v63 = vld [vmem:[#allocation5 + $0x50] sm:$0xf0] }
  0x45   : > { %508 = vmatpush.bf16.msra.mxu0 %v1159_v44  ;;  %v1134_v0 = vld [vmem:[#allocation5 + $0x48] sm:$0xf]  ;;  %v1366_v1 = vld [vmem:[#allocation5 + $0x54] sm:$0xf0]  ;;  %v1364_v2 = vld [vmem:[#allocation5 + $0x4c] sm:$0xf]  ;;  %v1127_v4 = vor.u32 %v1365_v60, %v1126_v59  ;;  %v1131_v5 = vor.u32 %v1363_v61, %v1128_v63 }
  0x46   : > { %522 = vmatpush.bf16.msra.mxu1 %v1163_v45  ;;  %v1136_v3 = vld [vmem:[#allocation5 + $0x58] sm:$0xf0]  ;;  %v1135_v6 = vor.u32 %v1366_v1, %v1134_v0  ;;  %v1110_v7 = vld [vmem:[#allocation5 + $0x20] sm:$0xf]  ;;  %v1361_v8 = vld [vmem:[#allocation5 + $0x2c] sm:$0xf0] }
  0x47   : > { %536 = vmatpush.bf16.msra.mxu2 %v1167_v46  ;;  %550 = vmatpush.bf16.msra.mxu3 %v1171_v50  ;;  %v1359_v9 = vld [vmem:[#allocation5 + $0x24] sm:$0xf]  ;;  %v1139_v10 = vor.u32 %v1364_v2, %v1136_v3  ;;  %v1112_v11 = vld [vmem:[#allocation5 + $0x30] sm:$0xf0]  ;;  %v1118_v12 = vld [vmem:[#allocation5 + $0x28] sm:$0xf]  ;;  %v1111_v16 = vor.u32 %v1361_v8, %v1110_v7 }
  0x48   : > { %v1362_v13 = vld [vmem:[#allocation5 + $0x34] sm:$0xf0]  ;;  %v1360_v14 = vld [vmem:[#allocation5 + $0x2c] sm:$0xf]  ;;  %v1120_v15 = vld [vmem:[#allocation5 + $0x38] sm:$0xf0]  ;;  %v1115_v17 = vor.u32 %v1359_v9, %v1112_v11 }
  0x49   : > { %509 = vmatpush.bf16.msra.mxu0 %v1143_v56  ;;  %v1119_v18 = vor.u32 %v1362_v13, %v1118_v12  ;;  %v1094_v19 = vld [vmem:[#allocation5] sm:$0xf]  ;;  %v1357_v20 = vld [vmem:[#allocation5 + $0xc] sm:$0xf0]  ;;  %v1355_v21 = vld [vmem:[#allocation5 + $0x4] sm:$0xf]  ;;  %v1123_v22 = vor.u32 %v1360_v14, %v1120_v15 }
  0x4a   : > { %523 = vmatpush.bf16.msra.mxu1 %v1147_v57  ;;  %v1096_v23 = vld [vmem:[#allocation5 + $0x10] sm:$0xf0]  ;;  %v1102_v24 = vld [vmem:[#allocation5 + $0x8] sm:$0xf]  ;;  %v1358_v25 = vld [vmem:[#allocation5 + $0x14] sm:$0xf0]  ;;  %v1095_v28 = vor.u32 %v1357_v20, %v1094_v19 }
  0x4b   : > { %537 = vmatpush.bf16.msra.mxu2 %v1151_v58  ;;  %551 = vmatpush.bf16.msra.mxu3 %v1155_v62  ;;  %v1356_v26 = vld [vmem:[#allocation5 + $0xc] sm:$0xf]  ;;  %v1104_v27 = vld [vmem:[#allocation5 + $0x18] sm:$0xf0]  ;;  %v1099_v29 = vor.u32 %v1355_v21, %v1096_v23  ;;  %v1103_v30 = vor.u32 %v1358_v25, %v1102_v24  ;;  %v1393_v35 = vld [vmem:[#allocation8 + $0x30] sm:$0xff]  ;;  %s1087_s28 = sshll.u32 %s1870_s17, 4 }
  0x4c   : > { %v1107_v31 = vor.u32 %v1356_v26, %v1104_v27  ;;  %v1354_v32 = vld [vmem:[%s1874_s11] sm:$0xff]  ;;  %v1391_v43 = vld [vmem:[#allocation8 + $0x20] sm:$0xff]  ;;  %v1889_v57 = vld [vmem:[#allocation7] sm:$0xf]  ;;  %s1419_s16 = sshll.u32 %s1776_s22, 4  ;;  %s292_s23 = scalar_lea.vmem [#allocation10], %s1087_s28 }
  0x4d   : > { %510 = vmatpush.bf16.msra.mxu0 %v1127_v4  ;;  %v1394_v33 = vld [vmem:[#allocation8 + $0x38] sm:$0xff]  ;;  %v1401_v36 = vld [vmem:[#allocation8 + $0x70] sm:$0xff]  ;;  %v1392_v39 = vld [vmem:[#allocation8 + $0x28] sm:$0xff]  ;;  %v331_v60 = vperm.slane %v1889_v57, 0  ;;  %v332_v63 = vperm.slane %v1889_v57, 1  ;;  %v334_v12 = vperm.slane %v1889_v57, 3  ;;  %s967_s13 = scalar_lea.hbm %s1965_s5, %s1419_s16 }
  0x4e   : > { %524 = vmatpush.bf16.msra.mxu1 %v1131_v5  ;;  %v1402_v34 = vld [vmem:[#allocation8 + $0x78] sm:$0xff]  ;;  %v1400_v40 = vld [vmem:[#allocation8 + $0x68] sm:$0xff]  ;;  %v1409_v41 = vld [vmem:[#allocation8 + $0xb0] sm:$0xff]  ;;  %s968_s12 = sshll.u32 %s292_s23, 4  ;;  %s970_s14 = sshll.u32 %s967_s13, 4  ;;  %s969_s12 = int_to_ptr.vmem [resolvable:$true] %s968_s12  ;;  %s971_s14 = int_to_ptr.hbm [resolvable:$true] %s970_s14 }
  0x4f   : > { %538 = vmatpush.bf16.msra.mxu2 %v1135_v6  ;;  %552 = vmatpush.bf16.msra.mxu3 %v1139_v10  ;;  %v1410_v37 = vld [vmem:[#allocation8 + $0xb8] sm:$0xff]  ;;  %v1417_v42 = vld [vmem:[#allocation8 + $0xf0] sm:$0xff]  ;;  %v1399_v44 = vld [vmem:[#allocation8 + $0x60] sm:$0xff]  ;;  %v333_v10 = vperm.slane %v1889_v57, 2  ;;  %s956_s22 = scalar_lea.sflag [#allocation4], %s1870_s17  ;;  %s1654_s15 = sshra.s32 %s971_s14, 4  ;;  %s1655_s15 = int_to_ptr.hbm [resolvable:$true] %s1654_s15 }
  0x50   : > { %v1418_v38 = vld [vmem:[#allocation8 + $0xf8] sm:$0xff]  ;;  %v1408_v45 = vld [vmem:[#allocation8 + $0xa8] sm:$0xff]  ;;  %v1407_v49 = vld [vmem:[#allocation8 + $0xa0] sm:$0xff]  ;;  %s1656_s7 = scalar_lea.hbm %s1655_s15, 16  ;;  %s1660_s11 = scalar_lea.hbm %s1965_s5, 32 }
  0x51   : > { %511 = vmatpush.bf16.msra.mxu0 %v1111_v16  ;;  %v1416_v46 = vld [vmem:[#allocation8 + $0xe8] sm:$0xff]  ;;  %v1390_v47 = vld [vmem:[#allocation8 + $0x18] sm:$0xff]  ;;  %v1415_v50 = vld [vmem:[#allocation8 + $0xe0] sm:$0xff]  ;;  %p1657_p1 = scmp.ne.s32.totalorder %s1655_s15, %s1656_s7  ;;  %p1661_p11 = scmp.lt.s32.totalorder %s1655_s15, %s1965_s5 }
  0x52   : > { %525 = vmatpush.bf16.msra.mxu1 %v1115_v17  ;;  %v1398_v48 = vld [vmem:[#allocation8 + $0x58] sm:$0xff]  ;;  %v1389_v51 = vld [vmem:[#allocation8 + $0x10] sm:$0xff]  ;;  %v1388_v55 = vld [vmem:[#allocation8 + $0x8] sm:$0xff]  ;;  %p1662_p9 = scmp.lt.s32.totalorder %s1660_s11, %s1656_s7 }
  0x53   : > { %539 = vmatpush.bf16.msra.mxu2 %v1119_v18  ;;  %553 = vmatpush.bf16.msra.mxu3 %v1123_v22  ;;  %v1397_v52 = vld [vmem:[#allocation8 + $0x50] sm:$0xff]  ;;  %v1406_v53 = vld [vmem:[#allocation8 + $0x98] sm:$0xff]  ;;  %v1396_v56 = vld [vmem:[#allocation8 + $0x48] sm:$0xff]  ;;  %p1658_p4 = pnand %p1657_p1, %p1840_p3 }
  0x54   : > { %v1414_v54 = vld [vmem:[#allocation8 + $0xd8] sm:$0xff]  ;;  %v1405_v58 = vld [vmem:[#allocation8 + $0x90] sm:$0xff]  ;;  %v1387_v61 = vld [vmem:[#allocation8] sm:$0xff]  ;;  %p1663_p2 = por %p1662_p9, %p1661_p11 }
  0x55   : > { %512 = vmatpush.bf16.msra.mxu0 %v1095_v28  ;;  %v1413_v59 = vld [vmem:[#allocation8 + $0xd0] sm:$0xff]  ;;  %v1395_v62 = vld [vmem:[#allocation8 + $0x40] sm:$0xff]  ;;  %v1404_v0 = vld [vmem:[#allocation8 + $0x88] sm:$0xff]  ;;  %p1659_p8 = pneg %p1658_p4 }
  0x56   : > { %526 = vmatpush.bf16.msra.mxu1 %v1099_v29  ;;  %v1412_v1 = vld [vmem:[#allocation8 + $0xc8] sm:$0xff]  ;;  %v1403_v7 = vld [vmem:[#allocation8 + $0x80] sm:$0xff] }
  0x57   : > { %540 = vmatpush.bf16.msra.mxu2 %v1103_v30  ;;  %554 = vmatpush.bf16.msra.mxu3 %v1107_v31  ;;  %v1411_v8 = vld [vmem:[#allocation8 + $0xc0] sm:$0xff]  ;;  %p1664_p10 = pnand %p1663_p2, %p1659_p8 }
  0x58   : > { %513 = vmatmul.bf16.vlgmr.msra.gmra.mxu0 %v1354_v32 }
  0x59   : > { %527 = vmatmul.bf16.vlgmr.msra.gmra.mxu1 %v1354_v32  ;;  %897 = vmatpush.bf16.msrb.mxu0 %v1394_v33 }
  0x5a   : > { %541 = vmatmul.bf16.vlgmr.msra.gmra.mxu2 %v1354_v32  ;;  %555 = vmatmul.bf16.vlgmr.msra.gmra.mxu3 %v1354_v32 }
  0x5b   : > { %911 = vmatpush.bf16.msrb.mxu1 %v1402_v34  ;;  %925 = vmatpush.bf16.msrb.mxu2 %v1410_v37 }
  0x5c   : > { %939 = vmatpush.bf16.msrb.mxu3 %v1418_v38 }
  0x5d   : > { %898 = vmatpush.bf16.msrb.mxu0 %v1393_v35 }
  0x5f   : > { %912 = vmatpush.bf16.msrb.mxu1 %v1401_v36  ;;  %926 = vmatpush.bf16.msrb.mxu2 %v1409_v41 }
  0x60   : > { %940 = vmatpush.bf16.msrb.mxu3 %v1417_v42 }
  0x61   : > { %899 = vmatpush.bf16.msrb.mxu0 %v1392_v39 }
  0x63   : > { %913 = vmatpush.bf16.msrb.mxu1 %v1400_v40  ;;  %927 = vmatpush.bf16.msrb.mxu2 %v1408_v45 }
  0x64   : > { %941 = vmatpush.bf16.msrb.mxu3 %v1416_v46 }
  0x65   : > { %900 = vmatpush.bf16.msrb.mxu0 %v1391_v43 }
  0x67   : > { %914 = vmatpush.bf16.msrb.mxu1 %v1399_v44  ;;  %928 = vmatpush.bf16.msrb.mxu2 %v1407_v49 }
  0x68   : > { %942 = vmatpush.bf16.msrb.mxu3 %v1415_v50 }
  0x69   : > { %901 = vmatpush.bf16.msrb.mxu0 %v1390_v47 }
  0x6b   : > { %915 = vmatpush.bf16.msrb.mxu1 %v1398_v48  ;;  %929 = vmatpush.bf16.msrb.mxu2 %v1406_v53 }
  0x6c   : > { %943 = vmatpush.bf16.msrb.mxu3 %v1414_v54 }
  0x6d   : > { %902 = vmatpush.bf16.msrb.mxu0 %v1389_v51 }
  0x6f   : > { %916 = vmatpush.bf16.msrb.mxu1 %v1397_v52  ;;  %930 = vmatpush.bf16.msrb.mxu2 %v1405_v58 }
  0x70   : > { %944 = vmatpush.bf16.msrb.mxu3 %v1413_v59 }
  0x71   : > { %903 = vmatpush.bf16.msrb.mxu0 %v1388_v55 }
  0x73   : > { %917 = vmatpush.bf16.msrb.mxu1 %v1396_v56  ;;  %931 = vmatpush.bf16.msrb.mxu2 %v1404_v0 }
  0x74   : > { %945 = vmatpush.bf16.msrb.mxu3 %v1412_v1 }
  0x75   : > { %904 = vmatpush.bf16.msrb.mxu0 %v1387_v61 }
  0x77   : > { %918 = vmatpush.bf16.msrb.mxu1 %v1395_v62  ;;  %932 = vmatpush.bf16.msrb.mxu2 %v1403_v7 }
  0x78   : > { %946 = vmatpush.bf16.msrb.mxu3 %v1411_v8 }
  0xd5   : > { %v514_v2 = vpop.f32.mrf.mxu0 }
  0xd6   : > { %v1893_v3 = vadd.f32 %v514_v2, %v331_v60  ;;  %v528_v4 = vpop.f32.mrf.mxu1 }
  0xd7   : > { %v1895_v5 = vadd.f32 %v528_v4, %v332_v63 }
  0xd8   : > { %v569_v6 = vmul.f32 0.044715, %v1893_v3 }
  0xd9   : > { %v570_v9 = vmul.f32 0.044715, %v1895_v5 }
  0xda   : > { %v577_v11 = vmul.f32 %v569_v6, %v1893_v3  ;;  %v561_v6 = vmul.f32 0.5, %v1893_v3 }
  0xdb   : > { %v578_v13 = vmul.f32 %v570_v9, %v1895_v5  ;;  %v562_v9 = vmul.f32 0.5, %v1895_v5 }
  0xdc   : > { %v585_v15 = vmul.f32 %v577_v11, %v1893_v3 }
  0xdd   : > { %v542_v14 = vpop.f32.mrf.mxu2  ;;  %v556_v17 = vpop.f32.mrf.mxu3  ;;  %v586_v19 = vmul.f32 %v578_v13, %v1895_v5 }
  0xde   : > { %v1904_v16 = vadd.f32 %v542_v14, %v333_v10  ;;  %v516_v18 = vpop.f32.mrf.mxu0  ;;  %v1907_v20 = vadd.f32 %v556_v17, %v334_v12  ;;  %v530_v22 = vpop.f32.mrf.mxu1  ;;  %v593_v23 = vadd.f32 %v585_v15, %v1893_v3 }
  0xdf   : > { %v517_v21 = vadd.f32 %v516_v18, %v331_v60  ;;  %v531_v25 = vadd.f32 %v530_v22, %v332_v63  ;;  %v594_v26 = vadd.f32 %v586_v19, %v1895_v5 }
  0xe0   : > { %v571_v24 = vmul.f32 0.044715, %v1904_v16  ;;  %v572_v27 = vmul.f32 0.044715, %v1907_v20  ;;  %v601_v33 = vmul.f32 0.7978846, %v593_v23 }
  0xe1   : > { %v573_v28 = vmul.f32 0.044715, %v517_v21  ;;  %v574_v30 = vmul.f32 0.044715, %v531_v25  ;;  %v602_v35 = vmul.f32 0.7978846, %v594_v26 }
  0xe2   : > { %v579_v29 = vmul.f32 %v571_v24, %v1904_v16  ;;  %v580_v31 = vmul.f32 %v572_v27, %v1907_v20  ;;  %1504 = vtanh.f32 %v601_v33  ;;  %v565_v7 = vmul.f32 0.5, %v517_v21 }
  0xe3   : > { %v581_v32 = vmul.f32 %v573_v28, %v517_v21  ;;  %v582_v34 = vmul.f32 %v574_v30, %v531_v25  ;;  %1506 = vtanh.f32 %v602_v35  ;;  %v563_v26 = vmul.f32 0.5, %v1904_v16 }
  0xe4   : > { %v587_v36 = vmul.f32 %v579_v29, %v1904_v16  ;;  %v588_v39 = vmul.f32 %v580_v31, %v1907_v20  ;;  %v564_v27 = vmul.f32 0.5, %v1907_v20 }
  0xe5   : > { %v544_v37 = vpop.f32.mrf.mxu2  ;;  %v589_v38 = vmul.f32 %v581_v32, %v517_v21  ;;  %v558_v41 = vpop.f32.mrf.mxu3  ;;  %v590_v42 = vmul.f32 %v582_v34, %v531_v25 }
  0xe6   : > { %v545_v40 = vadd.f32 %v544_v37, %v333_v10  ;;  %v595_v43 = vadd.f32 %v587_v36, %v1904_v16  ;;  %v559_v44 = vadd.f32 %v558_v41, %v334_v12  ;;  %v596_v46 = vadd.f32 %v588_v39, %v1907_v20  ;;  %v1503_v16 = vld [vmem:[%s1964_s4] ss:$0 sm:$0xff] }
  0xe7   : > { %v597_v45 = vadd.f32 %v589_v38, %v517_v21  ;;  %v598_v48 = vadd.f32 %v590_v42, %v531_v25  ;;  %v566_v10 = vmul.f32 0.5, %v531_v25 }
  0xe8   : > { %v575_v47 = vmul.f32 0.044715, %v545_v40  ;;  %v576_v49 = vmul.f32 0.044715, %v559_v44  ;;  %v603_v53 = vmul.f32 0.7978846, %v595_v43  ;;  %v1505_v57 = vpop.eup %1504 }
  0xe9   : > { %v605_v50 = vmul.f32 0.7978846, %v597_v45  ;;  %v606_v52 = vmul.f32 0.7978846, %v598_v48  ;;  %v604_v55 = vmul.f32 0.7978846, %v596_v46  ;;  %v1507_v59 = vpop.eup %1506 }
  0xea   : > { %v583_v51 = vmul.f32 %v575_v47, %v545_v40  ;;  %v584_v54 = vmul.f32 %v576_v49, %v559_v44  ;;  %v617_v62 = vadd.f32 1.0, %v1505_v57  ;;  %v618_v1 = vadd.f32 1.0, %v1507_v59 }
  0xeb   : > { %1508 = vtanh.f32 %v605_v50  ;;  %v567_v5 = vmul.f32 0.5, %v545_v40  ;;  %v568_v28 = vmul.f32 0.5, %v559_v44 }
  0xec   : > { %1510 = vtanh.f32 %v606_v52  ;;  %v591_v56 = vmul.f32 %v583_v51, %v545_v40  ;;  %v592_v58 = vmul.f32 %v584_v54, %v559_v44  ;;  %v625_v13 = vmul.f32 %v617_v62, %v561_v6 }
  0xed   : > { %1512 = vtanh.f32 %v603_v53  ;;  %v626_v17 = vmul.f32 %v618_v1, %v562_v9 }
  0xee   : > { %v599_v60 = vadd.f32 %v591_v56, %v545_v40  ;;  %v600_v61 = vadd.f32 %v592_v58, %v559_v44  ;;  %1514 = vtanh.f32 %v604_v55 }
  0xf0   : > { %v607_v63 = vmul.f32 0.7978846, %v599_v60  ;;  %v608_v2 = vmul.f32 0.7978846, %v600_v61 }
  0xf1   : > { %v1509_v0 = vpop.eup %1508 }
  0xf2   : > { %v1511_v4 = vpop.eup %1510  ;;  %v621_v8 = vadd.f32 1.0, %v1509_v0  ;;  %1516 = vtanh.f32 %v607_v63 }
  0xf3   : > { %v622_v11 = vadd.f32 1.0, %v1511_v4  ;;  %1518 = vtanh.f32 %v608_v2  ;;  %v1513_v12 = vpop.eup %1512 }
  0xf4   : > { %v629_v14 = vmul.f32 %v621_v8, %v565_v7  ;;  %v1515_v15 = vpop.eup %1514  ;;  %v619_v23 = vadd.f32 1.0, %v1513_v12 }
  0xf5   : > { %v630_v18 = vmul.f32 %v622_v11, %v566_v10  ;;  %v620_v3 = vadd.f32 1.0, %v1515_v15 }
  0xf6   : > { %v633_v19 = vpack.c.bf16 %v629_v14, %v625_v13  ;;  %v627_v30 = vmul.f32 %v619_v23, %v563_v26 }
  0xf7   : > { %v634_v22 = vpack.c.bf16 %v630_v18, %v626_v17  ;;  %v628_v32 = vmul.f32 %v620_v3, %v564_v27 }
  0xf8   : > { %v1517_v24 = vpop.eup %1516  ;;  %905 = vmatmul.bf16.vlgmr.msrb.gmra.mxu0 %v633_v19 }
  0xf9   : > { %v1519_v21 = vpop.eup %1518  ;;  %919 = vmatmul.bf16.vlgmr.msrb.gmra.mxu1 %v634_v22  ;;  %v623_v25 = vadd.f32 1.0, %v1517_v24 }
  0xfa   : > { %v624_v29 = vadd.f32 1.0, %v1519_v21 }
  0xfb   : > { %v631_v31 = vmul.f32 %v623_v25, %v567_v5 }
  0xfc   : > { %v632_v33 = vmul.f32 %v624_v29, %v568_v28 }
  0xfd   : > { %v635_v34 = vpack.c.bf16 %v631_v31, %v627_v30 }
  0xfe   : > { %v636_v35 = vpack.c.bf16 %v632_v33, %v628_v32 }
  0xff   : > { %933 = vmatmul.bf16.vlgmr.msrb.gmra.mxu2 %v635_v34 }
 0x100   : > { %947 = vmatmul.bf16.vlgmr.msrb.gmra.mxu3 %v636_v35 }
 0x175   : > { %v906_v36 = vpop.f32.mrf.mxu0 }
 0x176   : > { %v907_v37 = vadd.f32 %v1503_v16, %v906_v36  ;;  %v920_v38 = vpop.f32.mrf.mxu1 }
 0x178   : > { %v921_v20 = vadd.f32 %v920_v38, %v907_v37 }
 0x17d   : > { %v908_v39 = vpop.f32.mrf.mxu0 }
 0x17e   : > { %v909_v43 = vadd.f32 %v1503_v16, %v908_v39  ;;  %v922_v45 = vpop.f32.mrf.mxu1 }
 0x180   : > { %v923_v46 = vadd.f32 %v922_v45, %v909_v43 }
 0x182   : > { %v934_v40 = vpop.f32.mrf.mxu2 }
 0x183   : > { %v935_v41 = vadd.f32 %v934_v40, %v921_v20  ;;  %v948_v42 = vpop.f32.mrf.mxu3 }
 0x185   : > { %v949_v44 = vadd.f32 %v948_v42, %v935_v41 }
 0x187   : > { %953 = vst [vmem:[%s292_s23] sm:$0xff] %v949_v44 }
 0x18a   : > { %v936_v47 = vpop.f32.mrf.mxu2 }
 0x18b   : > { %v937_v48 = vadd.f32 %v936_v47, %v923_v46  ;;  %v950_v49 = vpop.f32.mrf.mxu3 }
 0x18d   : > { %v951_v50 = vadd.f32 %v950_v49, %v937_v48 }
 0x18f   : > { %954 = vst [vmem:[%s292_s23 + $0x8] sm:$0xff] %v951_v50 }
 0x190   : > { %1667 = shalt.err (!%p1664_p10)
}
 0x191   : > { %s1723_s17 = smov 128   ;;  %s1724_s28 = smov 8  }
 0x192   : > { %1434 = dma.vmem_to_hbm [thread:$0]  (%p1840_p3), %s969_s12, 256, %s971_s14, %s956_s22, %s1723_s17, %s1723_s17, %s1724_s28  }
 0x193 PF: > { %s985_s16 = sand.u32 1, %s1702_s18   ;;  %p1974_p12 = scmp.ge.s32.totalorder %s1714_s21, 2 }
 0x194   : > { %s986_s23 = scalar_lea.sflag [#allocation4], %s985_s16 }
 0x195   : > { %p1451_p13 = pnand %p1974_p12, %p1790_p6 }
 0x197   : > { %p1452_p0 = pneg %p1451_p13 }
 0x199   : > { %1697 = dma.done.wait (%p1452_p0), %s986_s23, 256  }
 0x19a   : > { %1699 = vsyncadd (%p1452_p0), %s986_s23, 4294967040  ;;  %p20_p5 = scmp.ge.s32.totalorder %s1827_s30, 4   ;;  %s1975_s18 = smov %s1706_s19 }
 0x19b   : > { %s1976_s19 = smov %s1710_s20  ;;  %s1977_s20 = smov %s1836_s9 }
 0x19c   : > { %s1978_s21 = smov %s1827_s30  ;;  %22 = sbr.rel (!%p20_p5) target bundleno = 7 (0x7), region = 97 }
 0x1a1   :  { %992 = vsyncpa [#allocation3], 1 }
 0x1a2   :  { %994 = vsyncpa [#allocation3 + $0x1], 1 }
 0x1a3   :  { %995 = vsyncpa [#allocation6], 1 }
 0x1a4   :  { %996 = vsyncpa [#allocation9], 1 }
 0x1a5   :  { %997 = vsyncpa [#allocation4], 1 }
 0x1a6   :  { %999 = vsyncpa [#allocation4 + $0x1], 1 }

</bundles_post_ra>
